<compile_context>
chip_gen: v6e
topology: v6e:2x2x1
jax: 0.10.0
libtpu: 0.0.40
codegen_flags: <defaults>
</compile_context>

<pallas_src>
import functools

import jax
import jax.numpy as jnp
from jax import lax
from jax.experimental import pallas as pl
from jax.experimental.pallas import tpu as pltpu


# ----------------------------------------------------------------------------
# Kernels
# ----------------------------------------------------------------------------
def _within_partial_kernel(labels_ref, x_ref, c_ref, out_ref,
                           *, batch, num_classes, distance, scaled):
    """Per-batch-tile partial sum of sigmoid(Dis(x_i, center_{y_i}))."""
    x = x_ref[...]                              # [tile_b, D]
    c = c_ref[...]                              # [C, D]     (resident)
    labels = labels_ref[...]                    # [tile_b, 1] int32
    tile_b, feat_dim = x.shape
    inv_scale = (1.0 / float(feat_dim)) if scaled else 1.0

    # One-hot gather of each sample's own center (exact: 0/1 mask) on the MXU.
    cls = lax.broadcasted_iota(jnp.int32, (tile_b, num_classes), 1)
    mask = (labels == cls).astype(c.dtype)                              # [tile_b, C]
    c_sel = lax.dot_general(mask, c, (((1,), (0,)), ((), ())),
                            preferred_element_type=jnp.float32)         # [tile_b, D]

    # TODO(synk): for bf16 inputs on v6e/v7x, the elementwise diff/abs below
    # could stay in bf16 (VPU-native) with an f32 reduction; kept f32 here.
    xf = x.astype(jnp.float32)
    if distance == "l2":
        diff = xf - c_sel
        d = jnp.sum(diff * diff, axis=1, keepdims=True)                 # [tile_b, 1]
    elif distance == "l1":
        d = jnp.sum(jnp.abs(xf - c_sel), axis=1, keepdims=True)
    else:  # dotproduct
        d = jnp.sum(xf * c_sel, axis=1, keepdims=True)
    d = d * inv_scale

    # Mask rows that are only batch padding.
    row = (pl.program_id(0) * tile_b
           + lax.broadcasted_iota(jnp.int32, (tile_b, 1), 0))
    sig = jnp.where(row < batch, jax.nn.sigmoid(d), 0.0)

    # Lane-dense unmasked store of this tile's partial sum.
    out_ref[...] = jnp.full((1, 8, 128), jnp.sum(sig), dtype=jnp.float32)


def _between_kernel(c_ref, out_ref, *, num_classes, distance, scaled):
    """Centers-only term: sum_i sigmoid(-sum_j Dis(c_i, c_j) / (C - 1))."""
    c = c_ref[...].astype(jnp.float32)          # [C, D]
    feat_dim = c.shape[1]
    inv_scale = (1.0 / float(feat_dim)) if scaled else 1.0

    if distance == "l2":
        # sum_j ||c_i - c_j||^2 = C*||c_i||^2 + S - 2*(c_i . s)
        c2 = jnp.sum(c * c, axis=1, keepdims=True)          # [C, 1] lane reduce
        S = jnp.sum(c2)                                      # scalar
        s = jnp.sum(c, axis=0, keepdims=True)                # [1, D] sublane reduce
        cis = jnp.sum(c * s, axis=1, keepdims=True)          # [C, 1]
        rowsum = float(num_classes) * c2 + S - 2.0 * cis     # [C, 1]
    elif distance == "l1":
        # Statically unrolled over rows (num_classes is a compile-time const);
        # accumulate the lane-reduced [C, 1] rowsum, not a [C, D] buffer.
        # TODO(synk): for very large num_classes, tile this over a grid axis.
        rowsum = jnp.zeros((num_classes, 1), jnp.float32)
        for j in range(num_classes):
            cj = c[j:j + 1, :]                               # static slice
            rowsum = rowsum + jnp.sum(jnp.abs(c - cj), axis=1, keepdims=True)
    else:  # dotproduct: sum_j c_i . c_j = c_i . (sum_j c_j)  (diag included,
        #                matching dist2.sum(dim=1) in the reference)
        s = jnp.sum(c, axis=0, keepdims=True)                # [1, D]
        rowsum = jnp.sum(c * s, axis=1, keepdims=True)       # [C, 1]

    rowsum = rowsum * inv_scale
    dist_between = -rowsum / (float(num_classes) - 1.0)
    out_ref[0] = jnp.sum(jax.nn.sigmoid(dist_between))


# ----------------------------------------------------------------------------
# Wrapper
# ----------------------------------------------------------------------------
def _round_up(n, m):
    return ((n + m - 1) // m) * m


def _choose_tile_batch(batch, feat_dim, itemsize):
    # Keep each x tile around <= 4 MiB so two double-buffered tiles plus the
    # resident centers block fit comfortably in v7x's 32 MiB scoped VMEM.
    rows = (4 * 1024 * 1024) // max(1, feat_dim * itemsize)
    rows = max(8, min(1024, rows))
    rows = (rows // 8) * 8
    return min(rows, _round_up(batch, 8))


def dfp_loss(x, labels, centers, *, beta=1.0, distance="l2", scaled=True,
             tile_batch=None):
    """Returns (loss, loss_within, loss_between) as f32 scalars."""
    assert distance in ("l1", "l2", "dotproduct")
    batch, feat_dim = x.shape
    num_classes, feat_dim_c = centers.shape
    assert feat_dim == feat_dim_c

    x_itemsize = x.dtype.itemsize
    c_itemsize = centers.dtype.itemsize

    # ---- batch tiling --------------------------------------------------------
    if tile_batch is None:
        tile_b = _choose_tile_batch(batch, feat_dim, x_itemsize)
    else:
        tile_b = max(8, (int(tile_batch) // 8) * 8)
        tile_b = min(tile_b, _round_up(batch, 8))
    padded = _round_up(batch, tile_b)
    num_tiles = padded // tile_b

    labels_i32 = labels.astype(jnp.int32)
    if padded != batch:
        x = jnp.pad(x, ((0, padded - batch), (0, 0)))
        labels_i32 = jnp.pad(labels_i32, (0, padded - batch))
    labels2d = labels_i32.reshape(-1, 1)

    # ---- VMEM budget (explicit, sized for v7x's smaller VMEM) ----------------
    vmem_needed = (2 * tile_b * feat_dim * x_itemsize        # double-buffered x
                   + 2 * tile_b * 4                          # labels tiles
                   + 2 * num_classes * feat_dim * c_itemsize  # centers (cons. x2)
                   + 2 * tile_b * num_classes * 4            # one-hot mask temp
                   + 2 * 8 * 128 * 4                         # partial-sum tiles
                   + (4 << 20))                              # headroom
    vmem_limit = int(min(max(vmem_needed, 16 << 20), 100 << 20))

    # ---- within-class term (batch-tiled, megacore "parallel") ----------------
    within_cost = pl.CostEstimate(
        flops=2 * padded * num_classes * feat_dim + 6 * padded * feat_dim,
        transcendentals=2 * padded,                          # sigmoid ~ exp + recip
        bytes_accessed=(padded * (feat_dim * x_itemsize + 4)
                        + num_classes * feat_dim * c_itemsize
                        + num_tiles * 8 * 128 * 4))

    within_kernel = functools.partial(
        _within_partial_kernel, batch=batch, num_classes=num_classes,
        distance=distance, scaled=scaled)

    partials = pl.pallas_call(
        within_kernel,
        out_shape=jax.ShapeDtypeStruct((num_tiles, 8, 128), jnp.float32),
        grid=(num_tiles,),
        in_specs=[
            pl.BlockSpec((tile_b, 1), lambda i: (i, 0)),                 # labels
            pl.BlockSpec((tile_b, feat_dim), lambda i: (i, 0)),          # x
            pl.BlockSpec((num_classes, feat_dim), lambda i: (0, 0)),     # centers
        ],
        out_specs=pl.BlockSpec((1, 8, 128), lambda i: (i, 0, 0)),
        compiler_params=pltpu.CompilerParams(
            dimension_semantics=("parallel",),
            vmem_limit_bytes=vmem_limit),
        cost_estimate=within_cost,
    )(labels2d, x, centers)
    loss_within = jnp.sum(partials[:, 0, 0]) / float(batch)

    # ---- between-class term (centers only, computed exactly once) ------------
    if distance == "l1":
        between_flops = 2 * num_classes * num_classes * feat_dim
    else:
        between_flops = 8 * num_classes * feat_dim
    between_cost = pl.CostEstimate(
        flops=between_flops,
        transcendentals=2 * num_classes,
        bytes_accessed=num_classes * feat_dim * c_itemsize + 4)

    between_kernel = functools.partial(
        _between_kernel, num_classes=num_classes,
        distance=distance, scaled=scaled)

    between_sum = pl.pallas_call(
        between_kernel,
        out_shape=jax.ShapeDtypeStruct((1,), jnp.float32),
        in_specs=[pl.BlockSpec(memory_space=pltpu.MemorySpace.VMEM)],
        out_specs=pl.BlockSpec(memory_space=pltpu.MemorySpace.SMEM),
        compiler_params=pltpu.CompilerParams(
            vmem_limit_bytes=int(min(max(4 * num_classes * feat_dim * c_itemsize
                                         + (4 << 20), 16 << 20), 100 << 20))),
        cost_estimate=between_cost,
    )(centers)
    loss_between = float(beta) * between_sum[0] / float(batch)

    loss = loss_within + loss_between
    return loss, loss_within, loss_between


# ----------------------------------------------------------------------------
# Pure-JAX reference (mirrors the PyTorch forward, pairwise-matrix form)
# ----------------------------------------------------------------------------
def dfp_loss_ref(x, labels, centers, *, beta=1.0, distance="l2", scaled=True):
    x = x.astype(jnp.float32)
    c = centers.astype(jnp.float32)
    batch, d = x.shape
    num_classes = c.shape[0]

    def pair(a, b):
        if distance == "l2":
            dist = (jnp.sum(a * a, 1, keepdims=True)
                    + jnp.sum(b * b, 1)[None, :]
                    - 2.0 * a @ b.T)
        elif distance == "l1":
            dist = jnp.sum(jnp.abs(a[:, None, :] - b[None, :, :]), -1)
        else:
            dist = a @ b.T
        return dist / d if scaled else dist

    dist = pair(x, c)
    mask = jax.nn.one_hot(labels, num_classes, dtype=jnp.float32)
    loss_within = jnp.sum(jax.nn.sigmoid(jnp.sum(dist * mask, 1))) / batch
    dist2 = pair(c, c)
    dist_between = -jnp.sum(dist2, 1) / (num_classes - 1.0)
    loss_between = beta * jnp.sum(jax.nn.sigmoid(dist_between)) / batch
    return loss_within + loss_between, loss_within, loss_between


# ----------------------------------------------------------------------------
if __name__ == "__main__":
    key = jax.random.PRNGKey(0)
    k_x, k_c, k_l, k_x2, k_l2 = jax.random.split(key, 5)

    batch, num_classes, feat_dim = 8, 10, 128
    x = jax.random.normal(k_x, (batch, feat_dim), dtype=jnp.float32)
    labels = jax.random.randint(k_l, (batch,), 0, num_classes, dtype=jnp.int32)
    # nn.Parameter(torch.randn(num_classes, feat_dim)) -> deterministic normal init
    centers = jax.random.normal(k_c, (num_classes, feat_dim), dtype=jnp.float32)

    for distance, beta in (("l2", 1.0), ("l1", 0.5), ("dotproduct", 1.0)):
        got = dfp_loss(x, labels, centers, beta=beta, distance=distance, scaled=True)
        jax.block_until_ready(got)
        ref = dfp_loss_ref(x, labels, centers, beta=beta, distance=distance, scaled=True)
        for g, r in zip(got, ref):
            assert jnp.allclose(g, r, rtol=1e-4, atol=1e-5), (distance, g, r)

    # Multi-tile + padding path (batch=20, tile_batch=8 -> 3 tiles, 4 padded rows).
    batch2 = 20
    x2 = jax.random.normal(k_x2, (batch2, feat_dim), dtype=jnp.float32)
    labels2 = jax.random.randint(k_l2, (batch2,), 0, num_classes, dtype=jnp.int32)
    got = dfp_loss(x2, labels2, centers, beta=0.7, distance="l2", scaled=False,
                   tile_batch=8)
    jax.block_until_ready(got)
    ref = dfp_loss_ref(x2, labels2, centers, beta=0.7, distance="l2", scaled=False)
    for g, r in zip(got, ref):
        assert jnp.allclose(g, r, rtol=1e-4, atol=1e-5), ("tiled-l2", g, r)

    print("KERNEL_OK")
</pallas_src>

<mosaic_0001>
module attributes {stable_mosaic.version = 11 : i64} {
  func.func @_within_partial_kernel(%arg0: i32, %arg1: memref<8x1xi32, #tpu.memory_space<vmem>>, %arg2: memref<8x128xf32, #tpu.memory_space<vmem>>, %arg3: memref<10x128xf32, #tpu.memory_space<vmem>>, %arg4: memref<1x8x128xf32, #tpu.memory_space<vmem>>) attributes {dimension_semantics = [#tpu.dimension_semantics<parallel>], iteration_bounds = array<i64: 1>, scalar_prefetch = 0 : i64, scratch_operands = 0 : i64, tpu.core_type = #tpu.core_type<tc>, window_params = [{transform_indices = @transform_0, window_bounds = array<i64: 8, 1>}, {transform_indices = @transform_1, window_bounds = array<i64: 8, 128>}, {pipeline_mode = #tpu.pipeline_mode<synchronous>, transform_indices = @transform_2, window_bounds = array<i64: 10, 128>}, {transform_indices = @transform_3, window_bounds = array<i64: 1, 8, 128>}]} {
    %c0 = arith.constant 0 : index
    %c0_0 = arith.constant 0 : index
    %0 = vector.load %arg2[%c0, %c0_0] : memref<8x128xf32, #tpu.memory_space<vmem>>, vector<8x128xf32>
    %c0_1 = arith.constant 0 : index
    %c0_2 = arith.constant 0 : index
    %1 = vector.load %arg3[%c0_1, %c0_2] : memref<10x128xf32, #tpu.memory_space<vmem>>, vector<10x128xf32>
    %c0_3 = arith.constant 0 : index
    %c0_4 = arith.constant 0 : index
    %2 = vector.load %arg1[%c0_3, %c0_4] : memref<8x1xi32, #tpu.memory_space<vmem>>, vector<8x1xi32>
    %3 = tpu.iota {dimensions = array<i32: 1>} : vector<8x10xi32>
    %4 = vector.broadcast %2 : vector<8x1xi32> to vector<8x10xi32>
    %5 = arith.cmpi eq, %4, %3 : vector<8x10xi32>
    %6 = arith.extui %5 : vector<8x10xi1> to vector<8x10xi32>
    %7 = arith.sitofp %6 : vector<8x10xi32> to vector<8x10xf32>
    %cst = arith.constant dense<0.000000e+00> : vector<8x128xf32>
    %8 = tpu.matmul %7, %1, %cst {dimension_numbers = #tpu.dot_dimension_numbers<[1], [0], [0], [1], [0, 0, 1, 1], [], []>} : vector<8x10xf32>, vector<10x128xf32>, vector<8x128xf32> -> vector<8x128xf32>
    %9 = arith.subf %0, %8 : vector<8x128xf32>
    %10 = arith.mulf %9, %9 : vector<8x128xf32>
    %cst_5 = arith.constant dense<0.000000e+00> : vector<8xf32>
    %11 = vector.multi_reduction <add>, %10, %cst_5 [1] : vector<8x128xf32> to vector<8xf32>
    %12 = vector.shape_cast %11 : vector<8xf32> to vector<8x1xf32>
    %cst_6 = arith.constant 7.812500e-03 : f32
    %13 = vector.broadcast %cst_6 : f32 to vector<8x1xf32>
    %14 = arith.mulf %12, %13 : vector<8x1xf32>
    %c8_i32 = arith.constant 8 : i32
    %15 = arith.muli %arg0, %c8_i32 : i32
    %16 = tpu.iota {dimensions = array<i32: 0>} : vector<8x1xi32>
    %17 = vector.broadcast %15 : i32 to vector<8x1xi32>
    %18 = arith.addi %17, %16 : vector<8x1xi32>
    %c8_i32_7 = arith.constant 8 : i32
    %19 = vector.broadcast %c8_i32_7 : i32 to vector<8x1xi32>
    %20 = arith.cmpi slt, %18, %19 : vector<8x1xi32>
    %21 = arith.negf %14 : vector<8x1xf32>
    %22 = math.exp %21 : vector<8x1xf32>
    %cst_8 = arith.constant 1.000000e+00 : f32
    %23 = vector.broadcast %cst_8 : f32 to vector<8x1xf32>
    %24 = arith.addf %23, %22 : vector<8x1xf32>
    %25 = arith.divf %23, %24 : vector<8x1xf32>
    %cst_9 = arith.constant 0.000000e+00 : f32
    %26 = vector.broadcast %cst_9 : f32 to vector<8x1xf32>
    %27 = arith.select %20, %25, %26 : vector<8x1xi1>, vector<8x1xf32>
    %28 = vector.shape_cast %27 : vector<8x1xf32> to vector<1x8x1xf32>
    %cst_10 = arith.constant dense<0.000000e+00> : vector<1xf32>
    %29 = vector.multi_reduction <add>, %28, %cst_10 [1, 2] : vector<1x8x1xf32> to vector<1xf32>
    %30 = vector.shape_cast %29 : vector<1xf32> to vector<1x1x1xf32>
    %31 = vector.extract %30[0, 0, 0] : f32 from vector<1x1x1xf32>
    %32 = vector.broadcast %31 : f32 to vector<1x8x128xf32>
    %c0_11 = arith.constant 0 : index
    %c0_12 = arith.constant 0 : index
    %c0_13 = arith.constant 0 : index
    %33 = vector.load %arg4[%c0_11, %c0_12, %c0_13] : memref<1x8x128xf32, #tpu.memory_space<vmem>>, vector<1x8x128xf32>
    tpu.vector_store %arg4[%c0_11, %c0_12, %c0_13], %32 {strides = array<i32>} : memref<1x8x128xf32, #tpu.memory_space<vmem>>, vector<1x8x128xf32>,
    return
  }
  func.func @transform_0(%arg0: i32) -> (i32, i32) {
    %c0_i32 = arith.constant 0 : i32
    %c0_i32_0 = arith.constant 0 : i32
    return %arg0, %c0_i32 : i32, i32
  }
  func.func @transform_1(%arg0: i32) -> (i32, i32) {
    %c0_i32 = arith.constant 0 : i32
    %c0_i32_0 = arith.constant 0 : i32
    return %arg0, %c0_i32 : i32, i32
  }
  func.func @transform_2(%arg0: i32) -> (i32, i32) {
    %c0_i32 = arith.constant 0 : i32
    %c0_i32_0 = arith.constant 0 : i32
    %c0_i32_1 = arith.constant 0 : i32
    return %c0_i32, %c0_i32_0 : i32, i32
  }
  func.func @transform_3(%arg0: i32) -> (i32, i32, i32) {
    %c0_i32 = arith.constant 0 : i32
    %c0_i32_0 = arith.constant 0 : i32
    %c0_i32_1 = arith.constant 0 : i32
    return %arg0, %c0_i32, %c0_i32_0 : i32, i32, i32
  }
}

</mosaic_0001>

<bundles_post_ra>
// kernel: tpu_custom_call.1
= control target key start
LH: loop header
LB: loop body
LE: loop exit
PB: predicated region body
PF: predicated region fallthrough
CT: control target
= control target key end

     0   :  { %8 = vsyncpa [#allocation3], 0  ;;  %s276_s0 = inlined_call_operand.vmem [shape: s32[8,1], index: 0, kind: input, shape index: {}]   ;;  %s277_s1 = inlined_call_operand.vmem [shape: f32[8,128], index: 1, kind: input, shape index: {}]   ;;  %s278_s2 = inlined_call_operand.hbm [shape: f32[10,128], index: 2, kind: input, shape index: {}]   ;;  %s279_s3 = inlined_call_operand.hbm [shape: f32[1,8,128], index: 3, kind: output, shape index: {}]  }
   0x1   :  { %9 = vsyncpa [#allocation4], 0  ;;  %s237_s12 = smov [#allocation2]  }
   0x2   :  { %s19_s13 = sshll.u32 %s237_s12, 4  ;;  %s20_s13 = int_to_ptr.vmem [resolvable:$true] %s19_s13 }
   0x3   :  { %s201_s14 = scalar_lea.vmem %s20_s13, 256  ;;  %p206_p1 = scmp.lt.s32.totalorder %s20_s13, %s20_s13 }
   0x4   :  { %p202_p0 = scmp.ne.s32.totalorder %s20_s13, %s201_s14  ;;  %p207_p2 = scmp.lt.s32.totalorder %s201_s14, %s201_s14 }
   0x6   :  { %p208_p3 = por %p207_p2, %p206_p1 }
   0x8   :  { %p209_p4 = pnand %p208_p3, %p202_p0 }
   0xa   :  { %212 = shalt.err (!%p209_p4)
}
   0xb   :  { %s238_s15 = smov 128   ;;  %s239_s16 = smov 8  }
   0xc   :  { %25 = dma.hbm_to_vmem [thread:$0]  %s278_s2, 256, %s20_s13, [#allocation3], %s238_s15, %s238_s15, %s239_s16  }
   0xd   :  { %233 = dma.done.wait [#allocation3], 256  }
   0xe   :  { %234 = vsyncadd [#allocation3], 4294967040  ;;  %v240_v0 = vmov 0   ;;  %v241_v1 = vmov 0.0   ;;  %vm45_vm0 = vcmask 1041408   ;;  %vm242_vm1 = vmmov 0  }
   0xf   :  { %188 = vset.pattern.permute.xlu0 %v240_v0  ;;  %172 = vmatprep.subr.mxu0 %v241_v1  ;;  %v32_v2 = vld [vmem:[%s276_s0] sm:$0xff]  ;;  %v31_v3 = vld [vmem:[#allocation2 + $0x8] sm:$0x3]  ;;  %v33_v5 = vlaneseq  ;;  %vm41_vm2 = vcmask 80896   ;;  %vm137_vm4 = vcmask 7168   ;;  %s243_s0 = smov [#allocation5]  }
  0x10   :  { %176 = vmatprep.mubr.msk.f32.mxu0 %vm242_vm1, %v241_v1  ;;  %v30_v4 = vld [vmem:[#allocation2] sm:$0xff]  ;;  %36 = vperm.xlu0 %188, %v32_v2  }
  0x11   :  { %173 = vmatpush3.msk.msra.mxu0 %vm45_vm0, %v31_v3  ;;  %v34_v6 = vand.u32 127, %v33_v5  ;;  %v29_v9 = vld [vmem:[%s277_s1] sm:$0xff]  ;;  %s156_s1 = sshll.u32 %s243_s0, 4  ;;  %s157_s1 = int_to_ptr.vmem [resolvable:$true] %s156_s1 }
  0x12   :  { %174 = vmatprep.subr.mxu0 %v241_v1  ;;  %s213_s23 = scalar_lea.vmem %s157_s1, 128  ;;  %p218_p6 = scmp.lt.s32.totalorder %s157_s1, %s157_s1 }
  0x13   :  { %175 = vmatpush3.msra.mxu0 %v30_v4  ;;  %p214_p5 = scmp.ne.s32.totalorder %s157_s1, %s213_s23  ;;  %p219_p7 = scmp.lt.s32.totalorder %s213_s23, %s213_s23 }
  0x15   :  { %p220_p8 = por %p219_p7, %p218_p6 }
  0x17   :  { %p221_p9 = pnand %p220_p8, %p214_p5 }
  0x8b   :  { %v37_v7 = vpop.permute.xlu0 %36 }
  0x8c   :  { %vm38_vm3 = vcmp.eq.s32.totalorder %v37_v7, %v34_v6 }
  0x8d   :  { %v165_v8 = vsel %vm38_vm3, 1.0, %v241_v1 }
  0x8e   :  { %177 = vmatmul.mubr.msk.f32.vlgmr.msra.gmra.mxu0 %vm41_vm2, %v165_v8 }
 0x14e   :  { %v115_v10 = vpop.f32.mrf.mxu0 }
 0x14f   :  { %v119_v11 = vsub.f32 %v29_v9, %v115_v10 }
 0x150   :  { %v178_v12 = vpop.f32.mrf.mxu0 }
 0x151   :  { %v120_v13 = vmul.f32 %v119_v11, %v119_v11 }
 0x153   :  { %121 = vadd.xlane.f32.xlu0 %v120_v13 }
 0x1dc   :  { %v122_v14 = vpop.xlane.xlu0 %121 }
 0x1dd   :  { %v168_v15 = vmul.f32 -0.0078125, %v122_v14 }
 0x1df   :  { %v131_v16 = vmul.f32 1.442695, %v168_v15 }
 0x1e1   :  { %189 = vpow2.f32 %v131_v16 }
 0x1ee   :  { %v190_v17 = vpop.eup %189 }
 0x1ef   :  { %v133_v18 = vadd.f32 1.0, %v190_v17 }
 0x1f1   :  { %191 = vrcp.f32 %v133_v18 }
 0x1fe   :  { %v192_v19 = vpop.eup %191 }
 0x1ff   :  { %v138_v20 = vsel %vm137_vm4, %v192_v19, 0.0 }
 0x200   :  { %139 = vadd.xlane.f32.xlu1 %v138_v20 }
 0x289   :  { %v140_v21 = vpop.xlane.xlu1 %139 }
 0x28a   :  { %v141_v22 = vrot.slane %v140_v21, 4 }
 0x28c   :  { %v142_v23 = vadd.f32 %v141_v22, %v140_v21 }
 0x28e   :  { %v143_v24 = vrot.slane %v142_v23, 2 }
 0x290   :  { %v144_v25 = vadd.f32 %v143_v24, %v142_v23 }
 0x292   :  { %v145_v26 = vrot.slane %v144_v25, 1 }
 0x294   :  { %v146_v27 = vadd.f32 %v145_v26, %v144_v25 }
 0x296   :  { %179 = vpush %v146_v27 }
 0x2c7   :  { %s180_s22 = spop %179 }
 0x2c8   :  { %v148_v28 = vstv %s180_s22 }
 0x2c9   :  { %149 = vst [vmem:[#allocation5] sm:$0xff] %v148_v28 }
 0x2ca   :  { %224 = shalt.err (!%p221_p9)
}
 0x2cb   :  { %159 = dma.vmem_to_hbm [thread:$0]  %s157_s1, 128, %s279_s3, [#allocation4]  }
 0x2cc   :  { %235 = dma.done.wait [#allocation4], 128  }
 0x2cd   :  { %236 = vsyncadd [#allocation4], 4294967168 }
 0x2ce   :  { %163 = vsyncpa [#allocation3], 1 }
 0x2cf   :  { %164 = vsyncpa [#allocation4], 1 }

</bundles_post_ra>
